<compile_context>
chip_gen: v6e
topology: v6e:2x2x1
jax: 0.10.0
libtpu: 0.0.40
codegen_flags: <defaults>
</compile_context>

<pallas_src>
import functools
import math

import numpy as np
import jax
import jax.numpy as jnp
from jax.experimental import pallas as pl
from jax.experimental.pallas import tpu as pltpu

QMIN, QMAX = -128, 127            # qint8 range
LANE = 128

MAX_BLOCK_BYTES = 2 << 20         # 2 MiB per int8 block buffer
MIN_BLOCK_BYTES = 64 << 10        # don't split into blocks smaller than this
MAX_BLOCK_ROWS = MAX_BLOCK_BYTES // LANE     # 16384 rows of 128 lanes
MIN_GRID_STEPS = 2                # >= 2 grid steps => both v7x TensorCores engage
VMEM_LIMIT_CEIL = 48 << 20        # below physical VMEM on v5e/v6e (128M) and v7x (64M)


def _round_up(x, m):
    return -(-x // m) * m


def _pick_block_rows(rows, cols):
    """Big blocks (amortize the ~0.35us/step pipeline overhead) while keeping
    >= MIN_GRID_STEPS steps for non-tiny tensors so the 'parallel' grid axis can
    shard across both v7x TensorCores.  Multiples of 32 (int8 sublane packing)."""
    max_rows = max(32, (MAX_BLOCK_BYTES // max(cols, 1)) // 32 * 32)
    min_rows = max(32, (MIN_BLOCK_BYTES // max(cols, 1)) // 32 * 32)
    if rows <= 2 * min_rows:
        return rows                                   # one full-extent block
    steps = max(MIN_GRID_STEPS, pl.cdiv(rows, max_rows))
    br = max(min_rows, pl.cdiv(rows, steps))
    br = _round_up(br, 32)
    return min(br, rows)


def _vmem_limit(n_data_refs, block_bytes):
    # double-buffered int8 data blocks + headroom for params / compiler scratch
    return int(min(VMEM_LIMIT_CEIL, n_data_refs * 2 * block_bytes + (16 << 20)))


def _offset_index_map(off_blk):
    def index_map(i):
        return (off_blk + i, 0)
    return index_map


# ----------------------------------------------------------------------------
# Pallas kernels.  All qparams arrive through a small f32 SMEM array so the
# compiled kernel is reused across every (scale, zero_point) combination.
# ----------------------------------------------------------------------------
def _binary_add_kernel(params_ref, x_ref, y_ref, o_ref, *, relu):
    # params = [a1, a2, b, out_zp]; a1 = xs/out_s, a2 = ys/out_s,
    # b = -(x_zp*a1 + y_zp*a2)  (constants folded on the host).
    a1 = params_ref[0]
    a2 = params_ref[1]
    b = params_ref[2]
    out_zp = params_ref[3]
    r = x_ref[...].astype(jnp.float32) * a1 + y_ref[...].astype(jnp.float32) * a2 + b
    q = jnp.round(r) + out_zp            # zp stays OUTSIDE round (tie behaviour)
    # ReLU folded into the clip lower bound: relu'd negatives map exactly to zp.
    lo = out_zp if relu else float(QMIN)
    o_ref[...] = jnp.clip(q, lo, float(QMAX)).astype(jnp.int8)


def _binary_mul_kernel(params_ref, x_ref, y_ref, o_ref):
    # params = [x_zp, y_zp, m, out_zp]; m = xs*ys/out_s
    xz = params_ref[0]
    yz = params_ref[1]
    m = params_ref[2]
    out_zp = params_ref[3]
    r = (x_ref[...].astype(jnp.float32) - xz) * (y_ref[...].astype(jnp.float32) - yz) * m
    q = jnp.round(r) + out_zp
    o_ref[...] = jnp.clip(q, float(QMIN), float(QMAX)).astype(jnp.int8)


def _affine_kernel(params_ref, x_ref, o_ref):
    # o = clip(round((x - a) * m) + zp); params = [a, m, zp, unused]
    a = params_ref[0]
    m = params_ref[1]
    zp = params_ref[2]
    q = jnp.round((x_ref[...].astype(jnp.float32) - a) * m) + zp
    o_ref[...] = jnp.clip(q, float(QMIN), float(QMAX)).astype(jnp.int8)


def _affine_into_kernel(params_ref, x_ref, prev_ref, o_ref):
    # Same as _affine_kernel, but the full concatenated output buffer is passed
    # through as an aliased input ('prev_ref') so only this chunk's row-blocks
    # are (re)written and every other chunk's rows are preserved in place.
    del prev_ref
    a = params_ref[0]
    m = params_ref[1]
    zp = params_ref[2]
    q = jnp.round((x_ref[...].astype(jnp.float32) - a) * m) + zp
    o_ref[...] = jnp.clip(q, float(QMIN), float(QMAX)).astype(jnp.int8)


# ----------------------------------------------------------------------------
# cached jitted wrappers (one compile per op / relu / shape -- qparams traced)
# ----------------------------------------------------------------------------
@functools.lru_cache(maxsize=None)
def _build_elementwise(op, relu, shape, n_inputs):
    shape = tuple(int(s) for s in shape)
    n = 1
    for s in shape:
        n *= s
    if n % LANE == 0:
        rows, cols = n // LANE, LANE                 # free flatten, dense lanes
    elif len(shape) >= 2:
        rows, cols = n // shape[-1], shape[-1]       # free 2-D view (ragged lanes)
    else:
        rows, cols = 1, max(n, 1)

    block_rows = _pick_block_rows(rows, cols)
    grid = (pl.cdiv(rows, block_rows),)

    if op == "add":
        kernel = functools.partial(_binary_add_kernel, relu=relu)
    elif op == "mul":
        kernel = _binary_mul_kernel
    else:
        kernel = _affine_kernel

    data_spec = pl.BlockSpec((block_rows, cols), lambda i: (i, 0))
    param_spec = pl.BlockSpec(memory_space=pltpu.MemorySpace.SMEM)

    call = pl.pallas_call(
        kernel,
        out_shape=jax.ShapeDtypeStruct((rows, cols), jnp.int8),
        grid=grid,
        in_specs=[param_spec] + [data_spec] * n_inputs,
        out_specs=data_spec,
        compiler_params=pltpu.CompilerParams(
            dimension_semantics=("parallel",),
            vmem_limit_bytes=_vmem_limit(n_inputs + 1, block_rows * cols)),
    )

    def run(params_arr, *arrays):
        flats = [a.reshape(rows, cols) for a in arrays]
        return call(params_arr, *flats).reshape(shape)

    return jax.jit(run)


def _run_elementwise(op, relu, params, arrays):
    run = _build_elementwise(op, bool(relu), tuple(arrays[0].shape), len(arrays))
    params_arr = jnp.asarray(params, dtype=jnp.float32)
    return run(params_arr, *arrays)


def _cat_chunk_block_rows(rows, off):
    cap = max(32, min(MAX_BLOCK_ROWS, rows) // 32 * 32)
    if off == 0:
        return cap
    return math.gcd(off, cap)        # divides the row offset; multiple of 32


@functools.lru_cache(maxsize=None)
def _build_cat_fused(chunk_rows, out_shape):
    """Requantize (or copy) each chunk directly into its row offset of the flat
    concatenated output: one HBM read + one HBM write total.  Later chunks take
    the running output buffer as an aliased input so untouched rows persist."""
    total_rows = sum(chunk_rows)
    param_spec = pl.BlockSpec(memory_space=pltpu.MemorySpace.SMEM)
    calls = []
    off = 0
    for r in chunk_rows:
        br = _cat_chunk_block_rows(r, off)
        grid = (pl.cdiv(r, br),)
        x_spec = pl.BlockSpec((br, LANE), lambda i: (i, 0))
        o_spec = pl.BlockSpec((br, LANE), _offset_index_map(off // br))
        cparams = pltpu.CompilerParams(
            dimension_semantics=("parallel",),
            vmem_limit_bytes=_vmem_limit(2, br * LANE))
        if off == 0:
            call = pl.pallas_call(
                _affine_kernel,
                out_shape=jax.ShapeDtypeStruct((total_rows, LANE), jnp.int8),
                grid=grid,
                in_specs=[param_spec, x_spec],
                out_specs=o_spec,
                compiler_params=cparams)
        else:
            call = pl.pallas_call(
                _affine_into_kernel,
                out_shape=jax.ShapeDtypeStruct((total_rows, LANE), jnp.int8),
                grid=grid,
                in_specs=[param_spec, x_spec,
                          pl.BlockSpec(memory_space=pl.ANY)],   # aliased, not DMA'd
                out_specs=o_spec,
                input_output_aliases={2: 0},
                compiler_params=cparams)
        calls.append(call)
        off += r

    def run(params_stack, *chunks):
        flats = [c.reshape(-1, LANE) for c in chunks]
        out = calls[0](params_stack[0], flats[0])
        for j in range(1, len(flats)):
            out = calls[j](params_stack[j], flats[j], out)
        return out.reshape(out_shape)

    return jax.jit(run)


# ----------------------------------------------------------------------------
# quantized-tensor container (glue, not kernel work)
# ----------------------------------------------------------------------------
class QTensor:
    """Minimal per-tensor-affine qint8 tensor (mirrors torch.quantize_per_tensor)."""

    def __init__(self, qvals, scale, zero_point):
        self.qvals = qvals                  # jnp.int8 array
        self.scale = float(scale)
        self.zero_point = int(zero_point)

    def dequantize(self):
        return (self.qvals.astype(jnp.float32) - self.zero_point) * self.scale


def quantize_per_tensor(x, scale, zero_point):
    q = jnp.clip(jnp.round(x * (1.0 / scale)) + zero_point, QMIN, QMAX)
    return QTensor(q.astype(jnp.int8), scale, zero_point)


# ----------------------------------------------------------------------------
# QFunctional
# ----------------------------------------------------------------------------
class QFunctional:
    """JAX/Pallas port of pytorch_nndct QFunctional (torch.ops.quantized.*)."""

    def __init__(self):
        self.scale = 1.0
        self.zero_point = 0
        # activation_post_process is nn.Identity() in the reference module.
        self.activation_post_process = lambda r: r

    def _get_name(self):
        return "QFunctional"

    def extra_repr(self):
        return "scale={}, zero_point={}".format(self.scale, self.zero_point)

    def forward(self, x):
        raise RuntimeError("Functional is not intended to use the 'forward'. "
                           "Please use the underlying operation")

    # --- torch.ops.quantized.add(x, y, scale, zero_point) ---
    def add(self, x, y):
        a1 = x.scale / self.scale
        a2 = y.scale / self.scale
        b = -(x.zero_point * a1 + y.zero_point * a2)
        vals = _run_elementwise("add", False,
                                (a1, a2, b, float(self.zero_point)),
                                [x.qvals, y.qvals])
        return self.activation_post_process(QTensor(vals, self.scale, self.zero_point))

    # --- torch.ops.quantized.add_relu(x, y, scale, zero_point) ---
    def add_relu(self, x, y):
        a1 = x.scale / self.scale
        a2 = y.scale / self.scale
        b = -(x.zero_point * a1 + y.zero_point * a2)
        vals = _run_elementwise("add", True,
                                (a1, a2, b, float(self.zero_point)),
                                [x.qvals, y.qvals])
        return self.activation_post_process(QTensor(vals, self.scale, self.zero_point))

    # --- torch.ops.quantized.mul(x, y, scale, zero_point) ---
    def mul(self, x, y):
        m = x.scale * y.scale / self.scale
        vals = _run_elementwise("mul", False,
                                (float(x.zero_point), float(y.zero_point), m,
                                 float(self.zero_point)),
                                [x.qvals, y.qvals])
        return self.activation_post_process(QTensor(vals, self.scale, self.zero_point))

    # --- torch.ops.quantized.cat(tensors, scale, zero_point, dim) ---
    def cat(self, xs, dim=0):
        nd = xs[0].qvals.ndim
        d = dim % nd if nd else 0
        out_shape = list(xs[0].qvals.shape)
        out_shape[d] = sum(int(x.qvals.shape[d]) for x in xs)
        out_shape = tuple(out_shape)

        lead = 1
        for s in out_shape[:d]:
            lead *= int(s)

        rows_list = []
        fused_ok = (lead == 1)
        if fused_ok:
            for x in xs:
                n = int(x.qvals.size)
                if n % LANE != 0 or (n // LANE) % 32 != 0:
                    fused_ok = False
                    break
                rows_list.append(n // LANE)

        if fused_ok:
            # Direct-write path: each chunk requantized straight into its row
            # offset of the concatenated output (single HBM read + write total).
            params = []
            for x in xs:
                if x.scale == self.scale and x.zero_point == self.zero_point:
                    params.append((0.0, 1.0, 0.0, 0.0))         # identity copy
                else:
                    params.append((float(x.zero_point), x.scale / self.scale,
                                   float(self.zero_point), 0.0))
            run = _build_cat_fused(tuple(rows_list), out_shape)
            vals = run(jnp.asarray(params, dtype=jnp.float32),
                       *[x.qvals for x in xs])
        else:
            # TODO(synk): extend the direct-write path to non-outermost concat
            # axes / non-(32*128)-aligned chunks (needs element-offset out_specs);
            # this fallback pays one extra HBM pass for the final concatenate.
            chunks = []
            for x in xs:
                if x.scale == self.scale and x.zero_point == self.zero_point:
                    chunks.append(x.qvals)                      # no kernel needed
                else:
                    p = (float(x.zero_point), x.scale / self.scale,
                         float(self.zero_point), 0.0)
                    chunks.append(_run_elementwise("affine", False, p, [x.qvals]))
            vals = jnp.concatenate(chunks, axis=d)
        return self.activation_post_process(QTensor(vals, self.scale, self.zero_point))

    # --- torch.ops.quantized.add_scalar(x, c)  (output qparams from input) ---
    def add_scalar(self, x, c):
        s, z = x.scale, x.zero_point
        c_q = int(round(c / s))                       # nearbyint(c / s)
        if z - c_q < QMIN:
            s_prime = (QMAX - (z - c_q)) / float(QMAX - QMIN) * s
            z_prime = QMIN
            params = (float(z - c_q), s / s_prime, float(z_prime), 0.0)
            vals = _run_elementwise("affine", False, params, [x.qvals])
        elif z - c_q > QMAX:
            s_prime = (z - c_q - QMIN) / float(QMAX - QMIN) * s
            z_prime = QMAX
            params = (float(z - c_q), s / s_prime, float(z_prime), 0.0)
            vals = _run_elementwise("affine", False, params, [x.qvals])
        else:
            # in range: stored int8 values unchanged -> no kernel, no HBM traffic
            s_prime, z_prime, vals = s, z - c_q, x.qvals
        return self.activation_post_process(QTensor(vals, s_prime, z_prime))

    # --- torch.ops.quantized.mul_scalar(x, c)  (output qparams from input) ---
    def mul_scalar(self, x, c):
        s, z = x.scale, x.zero_point
        if c == 0.0:
            # ATen mul_scalar(c==0): all-zero int repr, scale = 1.0, zero_point = 0
            r = QTensor(jnp.zeros_like(x.qvals), 1.0, 0)
        elif c > 0.0:
            r = QTensor(x.qvals, c * s, z)            # values unchanged, no kernel
        else:
            # Xq' = QMAX + QMIN - Xq ; z' = QMAX + QMIN - z ; s' = |c| * s
            params = (0.0, -1.0, float(QMAX + QMIN), 0.0)
            r = QTensor(_run_elementwise("affine", False, params, [x.qvals]),
                        abs(c) * s, QMAX + QMIN - z)
        return self.activation_post_process(r)

    @classmethod
    def from_float(cls, mod):
        # TODO(synk): the reference asserts type(mod) == Functional; here we only
        # duck-type the float observer's calculate_qparams().
        scale, zero_point = mod.activation_post_process.calculate_qparams()
        new_mod = cls()
        new_mod.scale = float(scale)
        new_mod.zero_point = int(zero_point)
        return new_mod

    # TODO(synk): _save_to_state_dict / _load_from_state_dict have no kernel
    # equivalent; scale / zero_point are plain Python attributes here.


# ----------------------------------------------------------------------------
# demo / check
# ----------------------------------------------------------------------------
if __name__ == "__main__":
    key = jax.random.PRNGKey(0)
    ks = jax.random.split(key, 8)

    shape = (2, 4, 16, 16)
    xf = jax.random.normal(ks[0], shape, dtype=jnp.float32)
    yf = jax.random.normal(ks[1], shape, dtype=jnp.float32)
    xq = quantize_per_tensor(xf, 0.05, 3)
    yq = quantize_per_tensor(yf, 0.04, -2)

    qf = QFunctional()
    qf.scale = 0.1
    qf.zero_point = 1

    r_add = qf.add(xq, yq)
    r_mul = qf.mul(xq, yq)
    r_add_relu = qf.add_relu(xq, yq)
    r_cat_mid = qf.cat([xq, yq], dim=1)             # non-outermost dim -> fallback
    r_add_s = qf.add_scalar(xq, 1.3)
    r_mul_s = qf.mul_scalar(xq, -0.7)

    # fused cat: dim=0, chunks of 4096 (= 32*128) elements -> direct-write path
    cshape = (2, 16, 128)
    aq = quantize_per_tensor(jax.random.normal(ks[2], cshape, jnp.float32), 0.05, 3)
    bq = quantize_per_tensor(jax.random.normal(ks[3], cshape, jnp.float32), 0.04, -2)
    r_cat_fused = qf.cat([aq, bq], dim=0)

    # cat whose chunk qparams already match the output (fallback path, no kernel)
    qf_same = QFunctional()
    qf_same.scale, qf_same.zero_point = xq.scale, xq.zero_point
    r_cat_same = qf_same.cat([xq, xq], dim=0)

    # ragged element count (5*130, not a multiple of 128): full-extent 2-D block
    rshape = (5, 130)
    xr = quantize_per_tensor(jax.random.normal(ks[4], rshape, jnp.float32), 0.05, 3)
    yr = quantize_per_tensor(jax.random.normal(ks[5], rshape, jnp.float32), 0.04, -2)
    r_add_ragged = qf.add(xr, yr)

    # medium tensor: exercises the multi-step grid + partial-last-block path
    mshape = (1030, 256)
    mx = quantize_per_tensor(jax.random.normal(ks[6], mshape, jnp.float32), 0.05, 3)
    my = quantize_per_tensor(jax.random.normal(ks[7], mshape, jnp.float32), 0.04, -2)
    r_add_med = qf.add_relu(mx, my)

    results = (r_add, r_mul, r_add_relu, r_cat_mid, r_add_s, r_mul_s,
               r_cat_fused, r_cat_same, r_add_ragged, r_add_med)
    for r in results:
        jax.block_until_ready(r.qvals)

    # light correctness checks against plain-JAX references (allow +-1 lsb)
    def ref_requant(real, scale, zero_point):
        return jnp.clip(jnp.round(real / scale) + zero_point,
                        QMIN, QMAX).astype(jnp.int8)

    def check(got, want):
        np.testing.assert_allclose(np.asarray(got, np.int32),
                                   np.asarray(want, np.int32), atol=1)

    s_o, z_o = qf.scale, qf.zero_point
    check(r_add.qvals, ref_requant(xq.dequantize() + yq.dequantize(), s_o, z_o))
    check(r_mul.qvals, ref_requant(xq.dequantize() * yq.dequantize(), s_o, z_o))
    check(r_add_relu.qvals,
          ref_requant(jnp.maximum(xq.dequantize() + yq.dequantize(), 0.0), s_o, z_o))
    check(r_cat_mid.qvals,
          jnp.concatenate([ref_requant(xq.dequantize(), s_o, z_o),
                           ref_requant(yq.dequantize(), s_o, z_o)], axis=1))
    check(r_cat_fused.qvals,
          jnp.concatenate([ref_requant(aq.dequantize(), s_o, z_o),
                           ref_requant(bq.dequantize(), s_o, z_o)], axis=0))
    check(r_add_ragged.qvals,
          ref_requant(xr.dequantize() + yr.dequantize(), s_o, z_o))
    check(r_add_med.qvals,
          ref_requant(jnp.maximum(mx.dequantize() + my.dequantize(), 0.0), s_o, z_o))

    assert r_cat_mid.qvals.shape == (2, 8, 16, 16) and r_cat_mid.qvals.dtype == jnp.int8
    assert r_cat_fused.qvals.shape == (4, 16, 128)
    assert r_cat_same.qvals.shape == (4, 4, 16, 16)
    assert r_add_s.qvals.shape == shape and r_mul_s.qvals.shape == shape
    assert r_mul.qvals.shape == shape

    print("KERNEL_OK")
</pallas_src>

<mosaic_0001>
module attributes {stable_mosaic.version = 11 : i64} {
  func.func @_binary_add_kernel(%arg0: i32, %arg1: memref<4xf32, #tpu.memory_space<smem>>, %arg2: memref<16x128xi8, #tpu.memory_space<vmem>>, %arg3: memref<16x128xi8, #tpu.memory_space<vmem>>, %arg4: memref<16x128xi8, #tpu.memory_space<vmem>>) attributes {dimension_semantics = [#tpu.dimension_semantics<parallel>], iteration_bounds = array<i64: 1>, scalar_prefetch = 0 : i64, scratch_operands = 0 : i64, tpu.core_type = #tpu.core_type<tc>, window_params = [{transform_indices = @transform_0, window_bounds = array<i64: 4>}, {transform_indices = @transform_1, window_bounds = array<i64: 16, 128>}, {transform_indices = @transform_2, window_bounds = array<i64: 16, 128>}, {transform_indices = @transform_3, window_bounds = array<i64: 16, 128>}]} {
    %c0 = arith.constant 0 : index
    %0 = memref.load %arg1[%c0] : memref<4xf32, #tpu.memory_space<smem>>
    %c1 = arith.constant 1 : index
    %1 = memref.load %arg1[%c1] : memref<4xf32, #tpu.memory_space<smem>>
    %c2 = arith.constant 2 : index
    %2 = memref.load %arg1[%c2] : memref<4xf32, #tpu.memory_space<smem>>
    %c3 = arith.constant 3 : index
    %3 = memref.load %arg1[%c3] : memref<4xf32, #tpu.memory_space<smem>>
    %c0_0 = arith.constant 0 : index
    %c0_1 = arith.constant 0 : index
    %4 = vector.load %arg2[%c0_0, %c0_1] : memref<16x128xi8, #tpu.memory_space<vmem>>, vector<16x128xi8>
    %5 = arith.sitofp %4 : vector<16x128xi8> to vector<16x128xf32>
    %6 = vector.broadcast %0 : f32 to vector<16x128xf32>
    %7 = arith.mulf %5, %6 : vector<16x128xf32>
    %c0_2 = arith.constant 0 : index
    %c0_3 = arith.constant 0 : index
    %8 = vector.load %arg3[%c0_2, %c0_3] : memref<16x128xi8, #tpu.memory_space<vmem>>, vector<16x128xi8>
    %9 = arith.sitofp %8 : vector<16x128xi8> to vector<16x128xf32>
    %10 = vector.broadcast %1 : f32 to vector<16x128xf32>
    %11 = arith.mulf %9, %10 : vector<16x128xf32>
    %12 = arith.addf %7, %11 : vector<16x128xf32>
    %13 = vector.broadcast %2 : f32 to vector<16x128xf32>
    %14 = arith.addf %12, %13 : vector<16x128xf32>
    %15 = math.roundeven %14 : vector<16x128xf32>
    %16 = vector.broadcast %3 : f32 to vector<16x128xf32>
    %17 = arith.addf %15, %16 : vector<16x128xf32>
    %cst = arith.constant -1.280000e+02 : f32
    %cst_4 = arith.constant 1.270000e+02 : f32
    %18 = vector.broadcast %cst : f32 to vector<16x128xf32>
    %19 = arith.maximumf %18, %17 : vector<16x128xf32>
    %20 = vector.broadcast %cst_4 : f32 to vector<16x128xf32>
    %21 = arith.minimumf %20, %19 : vector<16x128xf32>
    %22 = arith.fptosi %21 : vector<16x128xf32> to vector<16x128xi8>
    %c0_5 = arith.constant 0 : index
    %c0_6 = arith.constant 0 : index
    %23 = vector.load %arg4[%c0_5, %c0_6] : memref<16x128xi8, #tpu.memory_space<vmem>>, vector<16x128xi8>
    tpu.vector_store %arg4[%c0_5, %c0_6], %22 {strides = array<i32>} : memref<16x128xi8, #tpu.memory_space<vmem>>, vector<16x128xi8>,
    return
  }
  func.func @transform_0(%arg0: i32) -> i32 {
    %c0_i32 = arith.constant 0 : i32
    %c0_i32_0 = arith.constant 0 : i32
    return %c0_i32 : i32
  }
  func.func @transform_1(%arg0: i32) -> (i32, i32) {
    %c0_i32 = arith.constant 0 : i32
    %c0_i32_0 = arith.constant 0 : i32
    return %arg0, %c0_i32 : i32, i32
  }
  func.func @transform_2(%arg0: i32) -> (i32, i32) {
    %c0_i32 = arith.constant 0 : i32
    %c0_i32_0 = arith.constant 0 : i32
    return %arg0, %c0_i32 : i32, i32
  }
  func.func @transform_3(%arg0: i32) -> (i32, i32) {
    %c0_i32 = arith.constant 0 : i32
    %c0_i32_0 = arith.constant 0 : i32
    return %arg0, %c0_i32 : i32, i32
  }
}

</mosaic_0001>

<bundles_post_ra>
// kernel: run.1
= control target key start
LH: loop header
LB: loop body
LE: loop exit
PB: predicated region body
PF: predicated region fallthrough
CT: control target
= control target key end

     0   :  { %8 = vsyncpa [#allocation3], 0  ;;  %s164_s0 = inlined_call_operand.vmem [shape: f32[4], index: 0, kind: input, shape index: {}]   ;;  %s165_s1 = inlined_call_operand.vmem [shape: s8[16,128], index: 1, kind: input, shape index: {}]   ;;  %s166_s2 = inlined_call_operand.vmem [shape: s8[16,128], index: 2, kind: input, shape index: {}]   ;;  %s167_s3 = inlined_call_operand.vmem [shape: s8[16,128], index: 3, kind: output, shape index: {}]  }
   0x1   :  { %s15_s14 = sshll.u32 %s164_s0, 4  ;;  %s16_s14 = int_to_ptr.vmem [resolvable:$true] %s15_s14 }
   0x2   :  { %s114_s15 = scalar_lea.vmem %s16_s14, 16  ;;  %p119_p1 = scmp.lt.s32.totalorder %s16_s14, %s16_s14 }
   0x3   :  { %p115_p0 = scmp.ne.s32.totalorder %s16_s14, %s114_s15  ;;  %p120_p2 = scmp.lt.s32.totalorder %s114_s15, %s114_s15 }
   0x5   :  { %p121_p3 = por %p120_p2, %p119_p1 }
   0x7   :  { %p122_p4 = pnand %p121_p3, %p115_p0 }
   0x9   :  { %125 = shalt.err (!%p122_p4)
}
   0xa   :  { %s128_s16 = smov [#allocation2]  }
   0xb   :  { %18 = dma.vmem_to_smem %s16_s14, 16, %s128_s16, [#allocation3]  }
   0xc   :  { %126 = dma.done.wait [#allocation3], 16  }
   0xd   :  { %127 = vsyncadd [#allocation3], 4294967280 }
   0xe   :  { %26 = sfence }
   0xf   :  { %s27_s17 = sld [smem:[#allocation2]]  ;;  %v86_v0 = vld [vmem:[%s165_s1] sm:$0xf]  }
  0x10   :  { %v90_v1 = vld [vmem:[%s166_s2] sm:$0xf]   ;;  %s80_s21 = sld [smem:[#allocation2 + $0x1]]  ;;  %v87_v2 = vunpack.c.0.s8 %v86_v0  ;;  %v88_v4 = vunpack.c.1.s8 %v86_v0 }
  0x11   :  { %v91_v3 = vunpack.c.0.s8 %v90_v1  ;;  %v92_v5 = vunpack.c.1.s8 %v90_v1  ;;  %s81_s22 = sld [smem:[#allocation2 + $0x2]] }
  0x12   :  { %v35_v6 = vcvt.s32.f32 %v87_v2  ;;  %v36_v7 = vcvt.s32.f32 %v88_v4  ;;  %s82_s1 = sld [smem:[#allocation2 + $0x3]] }
  0x13   :  { %v44_v8 = vcvt.s32.f32 %v91_v3  ;;  %v45_v9 = vcvt.s32.f32 %v92_v5 }
  0x15   :  { %v37_v10 = vstv %s27_s17 }
  0x16   :  { %v38_v11 = vmul.f32 %v37_v10, %v35_v6  ;;  %v46_v12 = vstv %s80_s21  ;;  %v39_v13 = vmul.f32 %v37_v10, %v36_v7 }
  0x17   :  { %v47_v14 = vmul.f32 %v46_v12, %v44_v8  ;;  %v48_v15 = vmul.f32 %v46_v12, %v45_v9  ;;  %v51_v16 = vstv %s81_s22 }
  0x18   :  { %v56_v32 = vstv %s82_s1 }
  0x19   :  { %v49_v17 = vadd.f32 %v47_v14, %v38_v11  ;;  %v50_v18 = vadd.f32 %v48_v15, %v39_v13 }
  0x1b   :  { %v52_v19 = vadd.f32 %v51_v16, %v49_v17  ;;  %v53_v20 = vadd.f32 %v51_v16, %v50_v18 }
  0x1d   :  { %v95_v21 = vcvt.f32.s32 %v52_v19  ;;  %v93_v22 = vand.u32 2147483647, %v52_v19  ;;  %v103_v23 = vcvt.f32.s32 %v53_v20  ;;  %v98_v25 = vand.u32 2147483648, %v52_v19 }
  0x1e   :  { %v101_v26 = vand.u32 2147483647, %v53_v20  ;;  %v106_v28 = vand.u32 2147483648, %v53_v20 }
  0x1f   :  { %v96_v24 = vcvt.s32.f32 %v95_v21  ;;  %v104_v27 = vcvt.s32.f32 %v103_v23  ;;  %vm94_vm0 = vcmp.lt.f32.partialorder %v93_v22, 8388608.0 }
  0x20   :  { %vm102_vm1 = vcmp.lt.f32.partialorder %v101_v26, 8388608.0 }
  0x21   :  { %v97_v29 = vand.u32 2147483647, %v96_v24  ;;  %v105_v30 = vand.u32 2147483647, %v104_v27 }
  0x23   :  { %v99_v31 = vor.u32 %v98_v25, %v97_v29  ;;  %v107_v33 = vor.u32 %v106_v28, %v105_v30 }
  0x25   :  { %v100_v34 = vsel %vm94_vm0, %v99_v31, %v52_v19  ;;  %v108_v36 = vsel %vm102_vm1, %v107_v33, %v53_v20 }
  0x26   :  { %v57_v35 = vadd.f32 %v100_v34, %v56_v32  ;;  %v58_v37 = vadd.f32 %v108_v36, %v56_v32 }
  0x28   :  { %v83_v38 = vclampa-f32 %v57_v35, -128, 127  ;;  %v84_v39 = vclampa-f32 %v58_v37, -128, 127 }
  0x2a   :  { %v109_v40 = vtrunc.f32 %v83_v38  ;;  %v111_v41 = vtrunc.f32 %v84_v39 }
  0x2c   :  { %v110_v42 = vcvt.f32.s32 %v109_v40  ;;  %v112_v43 = vcvt.f32.s32 %v111_v41 }
  0x2e   :  { %v69_v44 = vpack.c.b16 %v110_v42, %v110_v42  ;;  %v71_v45 = vpack.c.b16 %v112_v43, %v112_v43 }
  0x30   :  { %v70_v46 = vpack.c.b8 %v69_v44, %v69_v44  ;;  %v72_v47 = vpack.c.b8 %v71_v45, %v71_v45 }
  0x32   :  { %73 = vst [vmem:[%s167_s3] sm:$0x3] %v70_v46  ;;  %74 = vst [vmem:[%s167_s3 + $0x2] sm:$0x3] %v72_v47 }
  0x33   :  { %79 = vsyncpa [#allocation3], 1 }

</bundles_post_ra>
